<compile_context>
chip_gen: v7x
topology: tpu7x:2x2x1
jax: 0.10.0
libtpu: 0.0.40
codegen_flags: <defaults>
</compile_context>

<pallas_src>
import math

import jax
import jax.numpy as jnp
from jax.experimental import pallas as pl
from jax.experimental.pallas import tpu as pltpu


def _dma_copy_kernel(x_hbm_ref, o_hbm_ref, copy_sem):
    # Single whole-array HBM -> HBM DMA; no VMEM/vreg round trip.
    copy = pltpu.make_async_copy(x_hbm_ref, o_hbm_ref, copy_sem)
    copy.start()
    copy.wait()


def _combined_shape(shape, dim, num_dims):
    dim = dim % len(shape)
    merged = math.prod(shape[dim:dim + num_dims])
    return shape[:dim] + (merged,) + shape[dim + num_dims:]


def _lane_dense_flat_shape(total):
    """Pick a (rows, cols) view with cols a large multiple of 128 when possible."""
    cols = 128
    if total % cols != 0:
        return (total,)  # fall back to a flat 1-D copy (still one contiguous DMA)
    while cols * 2 <= 2048 and total % (cols * 2) == 0:
        cols *= 2
    return (total // cols, cols)


def combine_dims_pallas(x, dim, num_dims=2, use_pallas=True):
    """CombineDim forward: merge `num_dims` consecutive axes starting at `dim`."""
    out_shape = _combined_shape(x.shape, dim, num_dims)

    if not use_pallas:
        # combine_dims is a contiguous row-major reshape -> zero bytes moved.
        return jnp.reshape(x, out_shape)

    total = x.size
    flat_shape = _lane_dense_flat_shape(total)

    # Free (contiguous) reshape at the XLA graph level: present a lane-dense
    # slab to the kernel instead of a lane-sparse NCHW tile.
    x_flat = jnp.reshape(x, flat_shape)

    out_flat = pl.pallas_call(
        _dma_copy_kernel,
        out_shape=jax.ShapeDtypeStruct(flat_shape, x.dtype),
        in_specs=[pl.BlockSpec(memory_space=pl.ANY)],   # raw HBM ref, no auto-DMA
        out_specs=pl.BlockSpec(memory_space=pl.ANY),    # raw HBM ref, no auto-DMA
        scratch_shapes=[pltpu.SemaphoreType.DMA],
    )(x_flat)

    return jnp.reshape(out_flat, out_shape)


if __name__ == "__main__":
    key = jax.random.PRNGKey(0)
    N, C, H, W = 2, 4, 16, 16
    x = jax.random.normal(key, (N, C, H, W), dtype=jnp.float32)

    # CombineDim(dim=1, num_dims=2) has no learnable parameters.
    y = combine_dims_pallas(x, dim=1, num_dims=2)
    y = jax.block_until_ready(y)

    # Reference: pure reshape (what torch's combine_dims produces).
    y_ref = jnp.reshape(x, (N, C * H, W))

    assert y.shape == (N, C * H, W), y.shape
    assert y.dtype == x.dtype
    assert jnp.array_equal(y, y_ref), "mismatch vs reference reshape"

    # Also exercise the zero-copy (pure reshape) path.
    y2 = jax.block_until_ready(combine_dims_pallas(x, dim=1, num_dims=2, use_pallas=False))
    assert jnp.array_equal(y2, y_ref)

    print("KERNEL_OK")
</pallas_src>

<mosaic_0001>
module attributes {stable_mosaic.version = 11 : i64} {
  func.func @_dma_copy_kernel(%arg0: memref<1x2048xf32, #tpu.memory_space<any>>, %arg1: memref<1x2048xf32, #tpu.memory_space<any>>, %arg2: memref<!tpu.dma_semaphore, #tpu.memory_space<semaphore_mem>>) attributes {dimension_semantics = [], scalar_prefetch = 0 : i64, scratch_operands = 1 : i64, tpu.core_type = #tpu.core_type<tc>} {
    tpu.enqueue_dma source(%arg0 : memref<1x2048xf32, #tpu.memory_space<any>>) target(%arg1 : memref<1x2048xf32, #tpu.memory_space<any>>) target_semaphore(%arg2 : memref<!tpu.dma_semaphore, #tpu.memory_space<semaphore_mem>>)
    tpu.wait_dma2 semaphore(%arg2 : memref<!tpu.dma_semaphore, #tpu.memory_space<semaphore_mem>>) src(%arg0 : memref<1x2048xf32, #tpu.memory_space<any>>) dst(%arg1 : memref<1x2048xf32, #tpu.memory_space<any>>)
    return
  }
}

</mosaic_0001>

<bundles_post_ra>
// kernel: tpu_custom_call.1
= control target key start
LH: loop header
LB: loop body
LE: loop exit
PB: predicated region body
PF: predicated region fallthrough
CT: control target
= control target key end

     0   :  { %s34_s6 = smov [#allocation2]   ;;  %s35_s7 = smov [#allocation3]   ;;  %s53_s0 = inlined_call_operand.hbm [shape: f32[1,2048], index: 0, kind: input, shape index: {}]   ;;  %s54_s1 = inlined_call_operand.hbm [shape: f32[1,2048], index: 1, kind: output, shape index: {}]  }
   0x1   :  { %s36_s8 = smov 0  }
   0x2   :  { %18 = dma.general %s53_s0, 256, %s54_s1, %s34_s6, %s35_s7, [#allocation4], %s36_s8, 0  }
   0x3   :  { %32 = dma.done.wait [#allocation2], 256 }
   0x4   :  { %33 = vsyncadd [#allocation2], 4294967040 }
   0x5   :  { %22 = vsyncmov [#allocation2] }
   0x8   :  { %s23_s13 = vpop.sfrf %22 }
   0x9   :  { %p28_p0 = scmp.ne.s32.totalorder %s23_s13, 0 }
   0xb   :  { %27 = shalt.err (%p28_p0)  }

</bundles_post_ra>
